<compile_context>
chip_gen: v7x
topology: tpu7x:2x2x1
jax: 0.10.0
libtpu: 0.0.40
codegen_flags: <defaults>
</compile_context>

<pallas_src>
import functools

import jax
import jax.numpy as jnp
from jax.experimental import pallas as pl
from jax.experimental.pallas import tpu as pltpu


def _round_up(x, m):
    return ((x + m - 1) // m) * m


def _fusion_mlp_kernel(audio_ref, lyrics_ref, midi_ref, mask_ref,
                       w1_ref, b1_ref, w2_ref, b2_ref, w3_ref, b3_ref,
                       out_ref, *, audio_dim, lyrics_dim):
    mask = mask_ref[...]                                       # (TB, 3) f32

    # Degradation-mask weighting on the VPU, then cast to bf16 so the MXU
    # sees native bf16 x bf16 contractions (f32 accumulation below).
    audio_w = (audio_ref[...] * mask[:, 0:1]).astype(jnp.bfloat16)   # (TB, 40)
    lyrics_w = (lyrics_ref[...] * mask[:, 1:2]).astype(jnp.bfloat16)  # (TB, 768)
    midi_w = midi_ref[...] * mask[:, 2:3]                      # (TB, 3) f32 (VPU)

    # fc1 on the concatenated features as a split contraction:
    #   concat([a, l, m]) @ W1 == l @ W1l + a @ W1a + m @ W1m
    # W1 arrives as ONE resident VMEM ref with rows pre-ordered
    # [lyrics | audio | midi] so the big lyrics slice starts at a
    # bf16-sublane-aligned offset (static slices -> zero-cost views).
    w1l = w1_ref[0:lyrics_dim, :]                              # (768, 256) bf16
    w1a = w1_ref[lyrics_dim:lyrics_dim + audio_dim, :]         # (40, 256)  bf16
    w1m = w1_ref[lyrics_dim + audio_dim:, :].astype(jnp.float32)  # (3, 256)

    # midi has K=3: three broadcast FMAs on the VPU instead of wasting an MXU
    # pass with 3/256 of the contraction lanes populated.
    h1 = (jnp.dot(lyrics_w, w1l, preferred_element_type=jnp.float32)
          + jnp.dot(audio_w, w1a, preferred_element_type=jnp.float32)
          + midi_w[:, 0:1] * w1m[0:1, :]
          + midi_w[:, 1:2] * w1m[1:2, :]
          + midi_w[:, 2:3] * w1m[2:3, :]
          + b1_ref[...])
    h1 = jnp.maximum(h1, 0.0)

    # fc2 + ReLU
    h2 = (jnp.dot(h1.astype(jnp.bfloat16), w2_ref[...],
                  preferred_element_type=jnp.float32) + b2_ref[...])
    h2 = jnp.maximum(h2, 0.0)

    # Output layer: feature dim pre-padded to 128 lanes -> unmasked vst.
    out_ref[...] = (jnp.dot(h2.astype(jnp.bfloat16), w3_ref[...],
                            preferred_element_type=jnp.float32)
                    + b3_ref[...]).astype(out_ref.dtype)


def prepare_params(params, *, audio_dim, lyrics_dim, nc_pad=128):
    """One-time param prep (do NOT call per step): bf16 weights, row-vector
    f32 biases, fc1 rows reordered to [lyrics|audio|midi], output head padded
    to 128 lanes."""
    w1 = params["w1"]
    w1_reord = jnp.concatenate(
        [w1[audio_dim:audio_dim + lyrics_dim],   # lyrics rows first (aligned)
         w1[:audio_dim],                         # audio rows
         w1[audio_dim + lyrics_dim:]],           # midi rows
        axis=0)
    num_classes = params["w3"].shape[1]
    pad = nc_pad - num_classes
    return {
        "w1": w1_reord.astype(jnp.bfloat16),
        "b1": params["b1"].reshape(1, -1).astype(jnp.float32),
        "w2": params["w2"].astype(jnp.bfloat16),
        "b2": params["b2"].reshape(1, -1).astype(jnp.float32),
        "w3": jnp.pad(params["w3"], ((0, 0), (0, pad))).astype(jnp.bfloat16),
        "b3": jnp.pad(params["b3"], ((0, pad),)).reshape(1, -1).astype(jnp.float32),
        "num_classes": num_classes,
    }


def supervised_dynamic_fusion_forward(audio_feat, lyrics_feat, midi_feat,
                                      degradation_mask, prep, *,
                                      batch_tile=512):
    """Pallas forward pass of SupervisedDynamicFusionModel."""
    B, audio_dim = audio_feat.shape
    lyrics_dim = lyrics_feat.shape[1]
    midi_dim = midi_feat.shape[1]
    mask_dim = degradation_mask.shape[1]
    in_dim, h1_dim = prep["w1"].shape
    h2_dim = prep["w2"].shape[1]
    nc_pad = prep["w3"].shape[1]
    num_classes = prep["num_classes"]

    # Batch tile: multiple of 8 sublanes, capped so double-buffered activation
    # tiles + resident weights stay far under the 16 MiB (v5e) scoped VMEM
    # default (and the 64 MiB physical VMEM on v7x).
    tb = min(batch_tile, _round_up(B, 8))
    grid = (pl.cdiv(B, tb),)

    def row_spec(d):                     # batch-tiled activations / output
        return pl.BlockSpec((tb, d), lambda i: (i, 0))

    def resident(r, c):                  # weights/biases: same block every step
        return pl.BlockSpec((r, c), lambda i: (0, 0))

    flops = 2 * B * (in_dim * h1_dim + h1_dim * h2_dim + h2_dim * nc_pad)
    bytes_accessed = (
        2 * (prep["w1"].size + prep["w2"].size + prep["w3"].size)      # bf16
        + 4 * (prep["b1"].size + prep["b2"].size + prep["b3"].size)    # f32
        + 4 * (audio_feat.size + lyrics_feat.size + midi_feat.size
               + degradation_mask.size)
        + 4 * B * nc_pad)

    kernel = functools.partial(_fusion_mlp_kernel,
                               audio_dim=audio_dim, lyrics_dim=lyrics_dim)

    out_padded = pl.pallas_call(
        kernel,
        out_shape=jax.ShapeDtypeStruct((B, nc_pad), jnp.float32),
        grid=grid,
        in_specs=[
            row_spec(audio_dim),
            row_spec(lyrics_dim),
            row_spec(midi_dim),
            row_spec(mask_dim),
            resident(in_dim, h1_dim),
            resident(1, h1_dim),
            resident(h1_dim, h2_dim),
            resident(1, h2_dim),
            resident(h2_dim, nc_pad),
            resident(1, nc_pad),
        ],
        out_specs=row_spec(nc_pad),
        compiler_params=pltpu.CompilerParams(
            dimension_semantics=("parallel",)),   # batch axis -> v7x megacore
        cost_estimate=pl.CostEstimate(
            flops=flops, transcendentals=0, bytes_accessed=bytes_accessed),
    )(audio_feat, lyrics_feat, midi_feat, degradation_mask,
      prep["w1"], prep["b1"], prep["w2"], prep["b2"], prep["w3"], prep["b3"])

    return out_padded[:, :num_classes]


def init_params(key, audio_dim=40, lyrics_dim=768, midi_dim=3, num_classes=5):
    in_dim = audio_dim + lyrics_dim + midi_dim
    ks = jax.random.split(key, 6)
    scale = 0.02
    return {
        "w1": scale * jax.random.normal(ks[0], (in_dim, 256), jnp.float32),
        "b1": scale * jax.random.normal(ks[1], (256,), jnp.float32),
        "w2": scale * jax.random.normal(ks[2], (256, 128), jnp.float32),
        "b2": scale * jax.random.normal(ks[3], (128,), jnp.float32),
        "w3": scale * jax.random.normal(ks[4], (128, num_classes), jnp.float32),
        "b3": scale * jax.random.normal(ks[5], (num_classes,), jnp.float32),
    }


def reference_forward(audio_feat, lyrics_feat, midi_feat, mask, params):
    a = audio_feat * mask[:, 0:1]
    l = lyrics_feat * mask[:, 1:2]
    m = midi_feat * mask[:, 2:3]
    fused = jnp.concatenate([a, l, m], axis=1)
    h1 = jnp.maximum(fused @ params["w1"] + params["b1"], 0.0)
    h2 = jnp.maximum(h1 @ params["w2"] + params["b2"], 0.0)
    return h2 @ params["w3"] + params["b3"]


if __name__ == "__main__":
    B = 8
    audio_dim, lyrics_dim, midi_dim, num_classes = 40, 768, 3, 5

    key = jax.random.PRNGKey(0)
    k_a, k_l, k_m, k_mask, k_params = jax.random.split(key, 5)

    audio_feat = jax.random.normal(k_a, (B, audio_dim), jnp.float32)
    lyrics_feat = jax.random.normal(k_l, (B, lyrics_dim), jnp.float32)
    midi_feat = jax.random.normal(k_m, (B, midi_dim), jnp.float32)
    degradation_mask = jax.random.uniform(k_mask, (B, 3), jnp.float32)

    params = init_params(k_params, audio_dim, lyrics_dim, midi_dim, num_classes)
    prep = prepare_params(params, audio_dim=audio_dim, lyrics_dim=lyrics_dim)

    out = supervised_dynamic_fusion_forward(
        audio_feat, lyrics_feat, midi_feat, degradation_mask, prep)
    out = jax.block_until_ready(out)

    ref = reference_forward(audio_feat, lyrics_feat, midi_feat,
                            degradation_mask, params)
    assert out.shape == (B, num_classes)
    # bf16 weights/activation-feeds with f32 accumulation: expected deviation
    # from the pure-f32 reference is ~1e-3; 1e-2 tolerance is a safe margin.
    assert jnp.allclose(out, ref, atol=1e-2, rtol=1e-2), "mismatch vs reference"

    print("KERNEL_OK")
</pallas_src>

<mosaic_0001>
module attributes {stable_mosaic.version = 11 : i64} {
  func.func @_fusion_mlp_kernel(%arg0: i32, %arg1: memref<8x40xf32, #tpu.memory_space<vmem>>, %arg2: memref<8x768xf32, #tpu.memory_space<vmem>>, %arg3: memref<8x3xf32, #tpu.memory_space<vmem>>, %arg4: memref<8x3xf32, #tpu.memory_space<vmem>>, %arg5: memref<811x256xbf16, #tpu.memory_space<vmem>>, %arg6: memref<1x256xf32, #tpu.memory_space<vmem>>, %arg7: memref<256x128xbf16, #tpu.memory_space<vmem>>, %arg8: memref<1x128xf32, #tpu.memory_space<vmem>>, %arg9: memref<128x128xbf16, #tpu.memory_space<vmem>>, %arg10: memref<1x128xf32, #tpu.memory_space<vmem>>, %arg11: memref<8x128xf32, #tpu.memory_space<vmem>>) attributes {dimension_semantics = [#tpu.dimension_semantics<parallel>], iteration_bounds = array<i64: 1>, scalar_prefetch = 0 : i64, scratch_operands = 0 : i64, tpu.core_type = #tpu.core_type<tc>, window_params = [{transform_indices = @transform_0, window_bounds = array<i64: 8, 40>}, {transform_indices = @transform_1, window_bounds = array<i64: 8, 768>}, {transform_indices = @transform_2, window_bounds = array<i64: 8, 3>}, {transform_indices = @transform_3, window_bounds = array<i64: 8, 3>}, {pipeline_mode = #tpu.pipeline_mode<synchronous>, transform_indices = @transform_4, window_bounds = array<i64: 811, 256>}, {pipeline_mode = #tpu.pipeline_mode<synchronous>, transform_indices = @transform_5, window_bounds = array<i64: 1, 256>}, {pipeline_mode = #tpu.pipeline_mode<synchronous>, transform_indices = @transform_6, window_bounds = array<i64: 256, 128>}, {pipeline_mode = #tpu.pipeline_mode<synchronous>, transform_indices = @transform_7, window_bounds = array<i64: 1, 128>}, {pipeline_mode = #tpu.pipeline_mode<synchronous>, transform_indices = @transform_8, window_bounds = array<i64: 128, 128>}, {pipeline_mode = #tpu.pipeline_mode<synchronous>, transform_indices = @transform_9, window_bounds = array<i64: 1, 128>}, {transform_indices = @transform_10, window_bounds = array<i64: 8, 128>}]} {
    %c0 = arith.constant 0 : index
    %c0_0 = arith.constant 0 : index
    %0 = vector.load %arg4[%c0, %c0_0] : memref<8x3xf32, #tpu.memory_space<vmem>>, vector<8x3xf32>
    %c0_1 = arith.constant 0 : index
    %c0_2 = arith.constant 0 : index
    %1 = vector.load %arg1[%c0_1, %c0_2] : memref<8x40xf32, #tpu.memory_space<vmem>>, vector<8x40xf32>
    %2 = vector.extract_strided_slice %0 {offsets = [0, 0], sizes = [8, 1], strides = [1, 1]} : vector<8x3xf32> to vector<8x1xf32>
    %3 = vector.broadcast %2 : vector<8x1xf32> to vector<8x40xf32>
    %4 = arith.mulf %1, %3 : vector<8x40xf32>
    %5 = arith.truncf %4 : vector<8x40xf32> to vector<8x40xbf16>
    %c0_3 = arith.constant 0 : index
    %c0_4 = arith.constant 0 : index
    %6 = vector.load %arg2[%c0_3, %c0_4] : memref<8x768xf32, #tpu.memory_space<vmem>>, vector<8x768xf32>
    %7 = vector.extract_strided_slice %0 {offsets = [0, 1], sizes = [8, 1], strides = [1, 1]} : vector<8x3xf32> to vector<8x1xf32>
    %8 = vector.broadcast %7 : vector<8x1xf32> to vector<8x768xf32>
    %9 = arith.mulf %6, %8 : vector<8x768xf32>
    %10 = arith.truncf %9 : vector<8x768xf32> to vector<8x768xbf16>
    %c0_5 = arith.constant 0 : index
    %c0_6 = arith.constant 0 : index
    %11 = vector.load %arg3[%c0_5, %c0_6] : memref<8x3xf32, #tpu.memory_space<vmem>>, vector<8x3xf32>
    %12 = vector.extract_strided_slice %0 {offsets = [0, 2], sizes = [8, 1], strides = [1, 1]} : vector<8x3xf32> to vector<8x1xf32>
    %13 = vector.broadcast %12 : vector<8x1xf32> to vector<8x3xf32>
    %14 = arith.mulf %11, %13 : vector<8x3xf32>
    %c0_7 = arith.constant 0 : index
    %c0_8 = arith.constant 0 : index
    %15 = vector.load %arg5[%c0_7, %c0_8] : memref<811x256xbf16, #tpu.memory_space<vmem>>, vector<768x256xbf16>
    %c768 = arith.constant 768 : index
    %c0_9 = arith.constant 0 : index
    %16 = vector.load %arg5[%c768, %c0_9] : memref<811x256xbf16, #tpu.memory_space<vmem>>, vector<40x256xbf16>
    %c808 = arith.constant 808 : index
    %c0_10 = arith.constant 0 : index
    %17 = vector.load %arg5[%c808, %c0_10] : memref<811x256xbf16, #tpu.memory_space<vmem>>, vector<3x256xbf16>
    %18 = arith.extf %17 : vector<3x256xbf16> to vector<3x256xf32>
    %cst = arith.constant dense<0.000000e+00> : vector<8x256xf32>
    %19 = tpu.matmul %10, %15, %cst {dimension_numbers = #tpu.dot_dimension_numbers<[1], [0], [0], [1], [0, 0, 1, 1], [], []>} : vector<8x768xbf16>, vector<768x256xbf16>, vector<8x256xf32> -> vector<8x256xf32>
    %cst_11 = arith.constant dense<0.000000e+00> : vector<8x256xf32>
    %20 = tpu.matmul %5, %16, %cst_11 {dimension_numbers = #tpu.dot_dimension_numbers<[1], [0], [0], [1], [0, 0, 1, 1], [], []>} : vector<8x40xbf16>, vector<40x256xbf16>, vector<8x256xf32> -> vector<8x256xf32>
    %21 = arith.addf %19, %20 : vector<8x256xf32>
    %22 = vector.extract_strided_slice %14 {offsets = [0, 0], sizes = [8, 1], strides = [1, 1]} : vector<8x3xf32> to vector<8x1xf32>
    %23 = vector.extract_strided_slice %18 {offsets = [0, 0], sizes = [1, 256], strides = [1, 1]} : vector<3x256xf32> to vector<1x256xf32>
    %24 = vector.broadcast %22 : vector<8x1xf32> to vector<8x256xf32>
    %25 = vector.broadcast %23 : vector<1x256xf32> to vector<8x256xf32>
    %26 = arith.mulf %24, %25 : vector<8x256xf32>
    %27 = arith.addf %21, %26 : vector<8x256xf32>
    %28 = vector.extract_strided_slice %14 {offsets = [0, 1], sizes = [8, 1], strides = [1, 1]} : vector<8x3xf32> to vector<8x1xf32>
    %29 = vector.extract_strided_slice %18 {offsets = [1, 0], sizes = [1, 256], strides = [1, 1]} : vector<3x256xf32> to vector<1x256xf32>
    %30 = vector.broadcast %28 : vector<8x1xf32> to vector<8x256xf32>
    %31 = vector.broadcast %29 : vector<1x256xf32> to vector<8x256xf32>
    %32 = arith.mulf %30, %31 : vector<8x256xf32>
    %33 = arith.addf %27, %32 : vector<8x256xf32>
    %34 = vector.extract_strided_slice %14 {offsets = [0, 2], sizes = [8, 1], strides = [1, 1]} : vector<8x3xf32> to vector<8x1xf32>
    %35 = vector.extract_strided_slice %18 {offsets = [2, 0], sizes = [1, 256], strides = [1, 1]} : vector<3x256xf32> to vector<1x256xf32>
    %36 = vector.broadcast %34 : vector<8x1xf32> to vector<8x256xf32>
    %37 = vector.broadcast %35 : vector<1x256xf32> to vector<8x256xf32>
    %38 = arith.mulf %36, %37 : vector<8x256xf32>
    %39 = arith.addf %33, %38 : vector<8x256xf32>
    %c0_12 = arith.constant 0 : index
    %c0_13 = arith.constant 0 : index
    %40 = vector.load %arg6[%c0_12, %c0_13] : memref<1x256xf32, #tpu.memory_space<vmem>>, vector<1x256xf32>
    %41 = vector.broadcast %40 : vector<1x256xf32> to vector<8x256xf32>
    %42 = arith.addf %39, %41 : vector<8x256xf32>
    %cst_14 = arith.constant 0.000000e+00 : f32
    %43 = vector.broadcast %cst_14 : f32 to vector<8x256xf32>
    %44 = arith.maximumf %42, %43 : vector<8x256xf32>
    %45 = arith.truncf %44 : vector<8x256xf32> to vector<8x256xbf16>
    %c0_15 = arith.constant 0 : index
    %c0_16 = arith.constant 0 : index
    %46 = vector.load %arg7[%c0_15, %c0_16] : memref<256x128xbf16, #tpu.memory_space<vmem>>, vector<256x128xbf16>
    %cst_17 = arith.constant dense<0.000000e+00> : vector<8x128xf32>
    %47 = tpu.matmul %45, %46, %cst_17 {dimension_numbers = #tpu.dot_dimension_numbers<[1], [0], [0], [1], [0, 0, 1, 1], [], []>} : vector<8x256xbf16>, vector<256x128xbf16>, vector<8x128xf32> -> vector<8x128xf32>
    %c0_18 = arith.constant 0 : index
    %c0_19 = arith.constant 0 : index
    %48 = vector.load %arg8[%c0_18, %c0_19] : memref<1x128xf32, #tpu.memory_space<vmem>>, vector<1x128xf32>
    %49 = vector.broadcast %48 : vector<1x128xf32> to vector<8x128xf32>
    %50 = arith.addf %47, %49 : vector<8x128xf32>
    %cst_20 = arith.constant 0.000000e+00 : f32
    %51 = vector.broadcast %cst_20 : f32 to vector<8x128xf32>
    %52 = arith.maximumf %50, %51 : vector<8x128xf32>
    %53 = arith.truncf %52 : vector<8x128xf32> to vector<8x128xbf16>
    %c0_21 = arith.constant 0 : index
    %c0_22 = arith.constant 0 : index
    %54 = vector.load %arg9[%c0_21, %c0_22] : memref<128x128xbf16, #tpu.memory_space<vmem>>, vector<128x128xbf16>
    %cst_23 = arith.constant dense<0.000000e+00> : vector<8x128xf32>
    %55 = tpu.matmul %53, %54, %cst_23 {dimension_numbers = #tpu.dot_dimension_numbers<[1], [0], [0], [1], [0, 0, 1, 1], [], []>} : vector<8x128xbf16>, vector<128x128xbf16>, vector<8x128xf32> -> vector<8x128xf32>
    %c0_24 = arith.constant 0 : index
    %c0_25 = arith.constant 0 : index
    %56 = vector.load %arg10[%c0_24, %c0_25] : memref<1x128xf32, #tpu.memory_space<vmem>>, vector<1x128xf32>
    %57 = vector.broadcast %56 : vector<1x128xf32> to vector<8x128xf32>
    %58 = arith.addf %55, %57 : vector<8x128xf32>
    %c0_26 = arith.constant 0 : index
    %c0_27 = arith.constant 0 : index
    %59 = vector.load %arg11[%c0_26, %c0_27] : memref<8x128xf32, #tpu.memory_space<vmem>>, vector<8x128xf32>
    tpu.vector_store %arg11[%c0_26, %c0_27], %58 {strides = array<i32>} : memref<8x128xf32, #tpu.memory_space<vmem>>, vector<8x128xf32>,
    return
  }
  func.func @transform_0(%arg0: i32) -> (i32, i32) {
    %c0_i32 = arith.constant 0 : i32
    %c0_i32_0 = arith.constant 0 : i32
    return %arg0, %c0_i32 : i32, i32
  }
  func.func @transform_1(%arg0: i32) -> (i32, i32) {
    %c0_i32 = arith.constant 0 : i32
    %c0_i32_0 = arith.constant 0 : i32
    return %arg0, %c0_i32 : i32, i32
  }
  func.func @transform_2(%arg0: i32) -> (i32, i32) {
    %c0_i32 = arith.constant 0 : i32
    %c0_i32_0 = arith.constant 0 : i32
    return %arg0, %c0_i32 : i32, i32
  }
  func.func @transform_3(%arg0: i32) -> (i32, i32) {
    %c0_i32 = arith.constant 0 : i32
    %c0_i32_0 = arith.constant 0 : i32
    return %arg0, %c0_i32 : i32, i32
  }
  func.func @transform_4(%arg0: i32) -> (i32, i32) {
    %c0_i32 = arith.constant 0 : i32
    %c0_i32_0 = arith.constant 0 : i32
    %c0_i32_1 = arith.constant 0 : i32
    return %c0_i32, %c0_i32_0 : i32, i32
  }
  func.func @transform_5(%arg0: i32) -> (i32, i32) {
    %c0_i32 = arith.constant 0 : i32
    %c0_i32_0 = arith.constant 0 : i32
    %c0_i32_1 = arith.constant 0 : i32
    return %c0_i32, %c0_i32_0 : i32, i32
  }
  func.func @transform_6(%arg0: i32) -> (i32, i32) {
    %c0_i32 = arith.constant 0 : i32
    %c0_i32_0 = arith.constant 0 : i32
    %c0_i32_1 = arith.constant 0 : i32
    return %c0_i32, %c0_i32_0 : i32, i32
  }
  func.func @transform_7(%arg0: i32) -> (i32, i32) {
    %c0_i32 = arith.constant 0 : i32
    %c0_i32_0 = arith.constant 0 : i32
    %c0_i32_1 = arith.constant 0 : i32
    return %c0_i32, %c0_i32_0 : i32, i32
  }
  func.func @transform_8(%arg0: i32) -> (i32, i32) {
    %c0_i32 = arith.constant 0 : i32
    %c0_i32_0 = arith.constant 0 : i32
    %c0_i32_1 = arith.constant 0 : i32
    return %c0_i32, %c0_i32_0 : i32, i32
  }
  func.func @transform_9(%arg0: i32) -> (i32, i32) {
    %c0_i32 = arith.constant 0 : i32
    %c0_i32_0 = arith.constant 0 : i32
    %c0_i32_1 = arith.constant 0 : i32
    return %c0_i32, %c0_i32_0 : i32, i32
  }
  func.func @transform_10(%arg0: i32) -> (i32, i32) {
    %c0_i32 = arith.constant 0 : i32
    %c0_i32_0 = arith.constant 0 : i32
    return %arg0, %c0_i32 : i32, i32
  }
}

</mosaic_0001>

<bundles_post_ra>
// kernel: tpu_custom_call.1
= control target key start
LH: loop header
LB: loop body
LE: loop exit
PB: predicated region body
PF: predicated region fallthrough
CT: control target
= control target key end

     0   :  { %15 = vsyncpa [#allocation3], 0  ;;  %s1945_s0 = inlined_call_operand.vmem [shape: f32[8,40], index: 0, kind: input, shape index: {}]   ;;  %s1946_s1 = inlined_call_operand.hbm [shape: f32[8,768], index: 1, kind: input, shape index: {}]   ;;  %s1947_s2 = inlined_call_operand.vmem [shape: f32[8,3], index: 2, kind: input, shape index: {}]   ;;  %s1948_s3 = inlined_call_operand.vmem [shape: f32[8,3], index: 3, kind: input, shape index: {}]   ;;  %s1949_s4 = inlined_call_operand.hbm [shape: bf16[811,256], index: 4, kind: input, shape index: {}]   ;;  %s1950_s5 = inlined_call_operand.vmem [shape: f32[1,256], index: 5, kind: input, shape index: {}]   ;;  %s1951_s6 = inlined_call_operand.hbm [shape: bf16[256,128], index: 6, kind: input, shape index: {}]   ;;  %s1952_s7 = inlined_call_operand.vmem [shape: f32[1,128], index: 7, kind: input, shape index: {}]   ;;  %s1953_s8 = inlined_call_operand.hbm [shape: bf16[128,128], index: 8, kind: input, shape index: {}]   ;;  %s1954_s9 = inlined_call_operand.vmem [shape: f32[1,128], index: 9, kind: input, shape index: {}]   ;;  %s1955_s10 = inlined_call_operand.hbm [shape: f32[8,128], index: 10, kind: output, shape index: {}]  }
   0x1   :  { %16 = vsyncpa [#allocation6], 0 }
   0x2   :  { %17 = vsyncpa [#allocation9], 0 }
   0x3   :  { %18 = vsyncpa [#allocation4], 0  ;;  %s1779_s13 = smov [#allocation5]   ;;  %s1661_s17 = scalar_lea.hbm %s1949_s4, 13056 }
   0x4   :  { %s40_s14 = sshll.u32 %s1779_s13, 4  ;;  %p1662_p0 = scmp.ne.s32.totalorder %s1949_s4, %s1661_s17  ;;  %s41_s14 = int_to_ptr.vmem [resolvable:$true] %s40_s14 }
   0x5   :  { %p1665_p1 = scmp.lt.u32.totalorder %s1661_s17, %s1949_s4 }
   0x7   :  { %p1667_p2 = pnand %p1665_p1, %p1662_p0 }
   0x9   :  { %1670 = shalt.err (!%p1667_p2)
}
   0xa   :  { %s1671_s22 = scalar_lea.vmem %s41_s14, 13056  ;;  %p1676_p4 = scmp.lt.s32.totalorder %s41_s14, %s41_s14 }
   0xb   :  { %p1672_p3 = scmp.ne.s32.totalorder %s41_s14, %s1671_s22  ;;  %p1677_p5 = scmp.lt.s32.totalorder %s1671_s22, %s1671_s22 }
   0xd   :  { %p1678_p6 = por %p1677_p5, %p1676_p4 }
   0xf   :  { %p1679_p7 = pnand %p1678_p6, %p1672_p3 }
  0x11   :  { %1682 = shalt.err (!%p1679_p7)
}
  0x12   :  { %s1780_s23 = smov 128   ;;  %s1781_s24 = smov 8  }
  0x13   :  { %46 = dma.hbm_to_vmem [thread:$0]  %s1949_s4, 13056, %s41_s14, [#allocation6], %s1780_s23, %s1780_s23, %s1781_s24  }
  0x14   :  { %s1782_s27 = smov [#allocation2]   ;;  %s1783_s29 = smov [#allocation7]  }
  0x15   :  { %s27_s28 = sshll.u32 %s1782_s27, 4  ;;  %s54_s30 = sshll.u32 %s1783_s29, 4  ;;  %s28_s28 = int_to_ptr.vmem [resolvable:$true] %s27_s28  ;;  %s55_s30 = int_to_ptr.vmem [resolvable:$true] %s54_s30 }
  0x16   :  { %s1683_s13 = scalar_lea.hbm %s1946_s1, 768 }
  0x17   :  { %p1684_p8 = scmp.ne.s32.totalorder %s1946_s1, %s1683_s13  ;;  %p1687_p9 = scmp.lt.u32.totalorder %s1683_s13, %s1946_s1 }
  0x19   :  { %p1689_p10 = pnand %p1687_p9, %p1684_p8 }
  0x1b   :  { %1692 = shalt.err (!%p1689_p10)
}
  0x1c   :  { %s1693_s4 = scalar_lea.vmem %s28_s28, 768  ;;  %p1698_p12 = scmp.lt.s32.totalorder %s28_s28, %s28_s28 }
  0x1d   :  { %p1694_p11 = scmp.ne.s32.totalorder %s28_s28, %s1693_s4  ;;  %p1699_p13 = scmp.lt.s32.totalorder %s1693_s4, %s1693_s4 }
  0x1f   :  { %p1700_p0 = por %p1699_p13, %p1698_p12 }
  0x21   :  { %p1701_p1 = pnand %p1700_p0, %p1694_p11 }
  0x23   :  { %1704 = shalt.err (!%p1701_p1)
}
  0x24   :  { %30 = dma.hbm_to_vmem [thread:$0]  %s1946_s1, 768, %s28_s28, [#allocation3]  }
  0x25   :  { %s1705_s22 = scalar_lea.hbm %s1951_s6, 2048 }
  0x26   :  { %p1706_p2 = scmp.ne.s32.totalorder %s1951_s6, %s1705_s22  ;;  %p1709_p3 = scmp.lt.u32.totalorder %s1705_s22, %s1951_s6 }
  0x28   :  { %p1711_p4 = pnand %p1709_p3, %p1706_p2 }
  0x2a   :  { %1714 = shalt.err (!%p1711_p4)
}
  0x2b   :  { %s1715_s27 = scalar_lea.vmem %s55_s30, 2048  ;;  %p1720_p6 = scmp.lt.s32.totalorder %s55_s30, %s55_s30 }
  0x2c   :  { %p1716_p5 = scmp.ne.s32.totalorder %s55_s30, %s1715_s27  ;;  %p1721_p7 = scmp.lt.s32.totalorder %s1715_s27, %s1715_s27 }
  0x2e   :  { %p1722_p8 = por %p1721_p7, %p1720_p6 }
  0x30   :  { %p1723_p9 = pnand %p1722_p8, %p1716_p5 }
  0x32   :  { %1726 = shalt.err (!%p1723_p9)
}
  0x33   :  { %s1784_s1 = smov 64   ;;  %s1785_s28 = smov 4  }
  0x34   :  { %60 = dma.hbm_to_vmem [thread:$0]  %s1951_s6, 2048, %s55_s30, [#allocation6], %s1784_s1, %s1784_s1, %s1785_s28  }
  0x35   :  { %s1786_s12 = smov [#allocation8]   ;;  %s1727_s17 = scalar_lea.hbm %s1953_s8, 1024 }
  0x36   :  { %s68_s13 = sshll.u32 %s1786_s12, 4  ;;  %p1728_p10 = scmp.ne.s32.totalorder %s1953_s8, %s1727_s17  ;;  %s69_s13 = int_to_ptr.vmem [resolvable:$true] %s68_s13 }
  0x37   :  { %p1731_p11 = scmp.lt.u32.totalorder %s1727_s17, %s1953_s8 }
  0x39   :  { %p1733_p12 = pnand %p1731_p11, %p1728_p10 }
  0x3b   :  { %1736 = shalt.err (!%p1733_p12)
}
  0x3c   :  { %s1737_s20 = scalar_lea.vmem %s69_s13, 1024  ;;  %p1742_p0 = scmp.lt.s32.totalorder %s69_s13, %s69_s13 }
  0x3d   :  { %p1738_p13 = scmp.ne.s32.totalorder %s69_s13, %s1737_s20  ;;  %p1743_p1 = scmp.lt.s32.totalorder %s1737_s20, %s1737_s20 }
  0x3f   :  { %p1744_p2 = por %p1743_p1, %p1742_p0 }
  0x41   :  { %p1745_p3 = pnand %p1744_p2, %p1738_p13 }
  0x43   :  { %1748 = shalt.err (!%p1745_p3)
}
  0x44   :  { %74 = dma.hbm_to_vmem [thread:$0]  %s1953_s8, 1024, %s69_s13, [#allocation9], %s1784_s1, %s1784_s1, %s1785_s28  }
  0x45   :  { %1771 = dma.done.wait [#allocation3], 768  }
  0x46   :  { %1772 = vsyncadd [#allocation3], 4294966528 }
  0x47   :  { %1773 = dma.done.wait [#allocation6], 15104  }
  0x48   :  { %1774 = vsyncadd [#allocation6], 4294952192 }
  0x49   :  { %1775 = dma.done.wait [#allocation9], 1024  }
  0x4a   :  { %1776 = vsyncadd [#allocation9], 4294966272  ;;  %v1787_v0 = vmov 0   ;;  %v90_v1 = vld [vmem:[%s1948_s3] sm:$0xff]  ;;  %v1485_v2 = vld [vmem:[#allocation5 + $0x4] ss:$8 sps:$4 sm:$0xff]  }
  0x4b   :  { %1479 = vset.pattern.permute.xlu0 %v1787_v0  ;;  %299 = vmatprep.mubr.bf16.mxu0 %v1787_v0  ;;  %v1487_v3 = vld [vmem:[#allocation5] ss:$8 sps:$4 sm:$0xff]   ;;  %v1488_v4 = vld [vmem:[#allocation5 + $0x14] ss:$8 sps:$4 sm:$0xff]   ;;  %v1490_v5 = vld [vmem:[#allocation5 + $0x10] ss:$8 sps:$4 sm:$0xff]  }
  0x4c   :  { %94 = vperm.xlu0 %1479, %v90_v1   ;;  %788 = vmatprep.subr.bf16.mxu1 %v1485_v2  ;;  %v1788_v6 = vmov 1   ;;  %v1491_v7 = vld [vmem:[#allocation5 + $0x24] ss:$8 sps:$4 sm:$0xff]   ;;  %v1493_v8 = vld [vmem:[#allocation5 + $0x20] ss:$8 sps:$4 sm:$0xff]   ;;  %vm260_vm0 = vcmask 1043456  }
  0x4d   :  { %789 = vmatpush1.bf16.msra.mxu1 %v1487_v3  ;;  %v1494_v9 = vld [vmem:[#allocation5 + $0x34] ss:$8 sps:$4 sm:$0xff]   ;;  %v1496_v10 = vld [vmem:[#allocation5 + $0x30] ss:$8 sps:$4 sm:$0xff]   ;;  %v1497_v11 = vld [vmem:[#allocation5 + $0x44] ss:$8 sps:$4 sm:$0xff]  }
  0x4e   :  { %790 = vmatprep.subr.bf16.mxu1 %v1488_v4  ;;  %v1499_v12 = vld [vmem:[#allocation5 + $0x40] ss:$8 sps:$4 sm:$0xff]   ;;  %v1500_v13 = vld [vmem:[#allocation5 + $0x54] ss:$8 sps:$4 sm:$0xff]   ;;  %v1521_v14 = vld [vmem:[#allocation5 + $0x304] ss:$8 sps:$4 sm:$0xff]  }
  0x4f   :  { %v1523_v15 = vld [vmem:[#allocation5 + $0x300] ss:$8 sps:$4 sm:$0xff]   ;;  %v1502_v16 = vld [vmem:[#allocation5 + $0x50] ss:$8 sps:$4 sm:$0xff]   ;;  %267 = vmatprep.subr.bf16.mxu0 %v1521_v14  ;;  %v1527_v17 = vld [vmem:[#allocation5 + $0x314] ss:$8 sps:$4 sm:$0xff]  }
  0x50   :  { %1480 = vset.pattern.permute.xlu0 %v1788_v6  ;;  %268 = vmatpush1.bf16.msra.mxu0 %v1523_v15  ;;  %v1529_v18 = vld [vmem:[#allocation5 + $0x310] ss:$8 sps:$4 sm:$0xff]   ;;  %v1503_v19 = vld [vmem:[#allocation5 + $0x64] ss:$8 sps:$4 sm:$0xff]   ;;  %v1789_v23 = vmov 2   ;;  %vm256_vm1 = vcmask 326656  }
  0x51   :  { %106 = vperm.xlu0 %1480, %v90_v1   ;;  %791 = vmatpush1.bf16.msra.mxu1 %v1490_v5  ;;  %v227_v20 = vld [vmem:[#allocation5 + $0x320] sm:$0xff]  ;;  %v1506_v25 = vld [vmem:[#allocation5 + $0x74] ss:$8 sps:$4 sm:$0xff]   ;;  %v1508_v28 = vld [vmem:[#allocation5 + $0x70] ss:$8 sps:$4 sm:$0xff]   ;;  %vm1791_vm2 = vmmov 0  }
  0x52   :  { %792 = vmatprep.subr.bf16.mxu1 %v1491_v7  ;;  %269 = vmatprep.subr.bf16.mxu0 %v1527_v17  ;;  %v1289_v21 = vcombine.high %v227_v20, %v227_v20  ;;  %v1288_v22 = vcombine.low %v227_v20, %v227_v20  ;;  %v1505_v24 = vld [vmem:[#allocation5 + $0x60] ss:$8 sps:$4 sm:$0xff]   ;;  %v1540_v27 = vld [vmem:[#allocation5 + $0x104] ss:$8 sps:$4 sm:$0xff]   ;;  %v1512_v31 = vld [vmem:[#allocation5 + $0x94] ss:$8 sps:$4 sm:$0xff]  }
  0x53   :  { %1481 = vset.pattern.permute.xlu1 %v1789_v23  ;;  %v1509_v29 = vld [vmem:[#allocation5 + $0x84] ss:$8 sps:$4 sm:$0xff]   ;;  %v1511_v30 = vld [vmem:[#allocation5 + $0x80] ss:$8 sps:$4 sm:$0xff]   ;;  %v1514_v32 = vld [vmem:[#allocation5 + $0x90] ss:$8 sps:$4 sm:$0xff]  }
  0x54   :  { %123 = vperm.xlu1 %1481, %v90_v1   ;;  %270 = vmatpush1.bf16.msra.mxu0 %v1529_v18  ;;  %v262_v26 = vsel %vm260_vm0, %v1288_v22, 0  ;;  %v1515_v33 = vld [vmem:[#allocation5 + $0xa4] ss:$8 sps:$4 sm:$0xff]   ;;  %v1517_v34 = vld [vmem:[#allocation5 + $0xa0] ss:$8 sps:$4 sm:$0xff]   ;;  %v91_v46 = vld [vmem:[%s1945_s0] sm:$0xff] }
  0x55   :  { %793 = vmatpush1.bf16.msra.mxu1 %v1493_v8  ;;  %1484 = vset.pattern.permute.xlu0 %v1789_v23  ;;  %v1518_v35 = vld [vmem:[#allocation5 + $0xb4] ss:$8 sps:$4 sm:$0xff]   ;;  %v1520_v36 = vld [vmem:[#allocation5 + $0xb0] ss:$8 sps:$4 sm:$0xff]   ;;  %v1524_v37 = vld [vmem:[#allocation5 + $0xc4] ss:$8 sps:$4 sm:$0xff]  }
  0x56   :  { %794 = vmatprep.subr.bf16.mxu1 %v1494_v9  ;;  %1290 = vmatprep.subr.msk.bf16.mxu0 %vm260_vm0, %v1289_v21  ;;  %v1526_v38 = vld [vmem:[#allocation5 + $0xc0] ss:$8 sps:$4 sm:$0xff]   ;;  %v1530_v39 = vld [vmem:[#allocation5 + $0xd4] ss:$8 sps:$4 sm:$0xff]   ;;  %v1532_v40 = vld [vmem:[#allocation5 + $0xd0] ss:$8 sps:$4 sm:$0xff]  }
  0x57   :  { %v1535_v41 = vld [vmem:[#allocation5 + $0xe4] ss:$8 sps:$4 sm:$0xff]   ;;  %v1537_v42 = vld [vmem:[#allocation5 + $0xe0] ss:$8 sps:$4 sm:$0xff]   ;;  %v1541_v43 = vld [vmem:[#allocation5 + $0xf4] ss:$8 sps:$4 sm:$0xff]  }
  0x58   :  { %1482 = vset.pattern.permute.xlu1 %v1787_v0  ;;  %272 = vmatpush1.bf16.msra.mxu0 %v262_v26  ;;  %v1543_v44 = vld [vmem:[#allocation5 + $0xf0] ss:$8 sps:$4 sm:$0xff]   ;;  %v1549_v45 = vld [vmem:[#allocation5 + $0x204] ss:$8 sps:$4 sm:$0xff]   ;;  %v1538_v49 = vld [vmem:[#allocation5 + $0x100] ss:$8 sps:$4 sm:$0xff]  }
  0x59   :  { %795 = vmatpush1.bf16.msra.mxu1 %v1496_v10  ;;  %829 = vmatprep.subr.bf16.mxu0 %v1540_v27  ;;  %v1546_v50 = vld [vmem:[#allocation5 + $0x114] ss:$8 sps:$4 sm:$0xff]   ;;  %v102_v53 = vld [vmem:[#allocation2 + $0x18] sm:$0xff]  ;;  %v1544_v57 = vld [vmem:[#allocation5 + $0x110] ss:$8 sps:$4 sm:$0xff]   ;;  %s1792_s1 = smov [#allocation10]  }
  0x5a   :  { %796 = vmatprep.subr.bf16.mxu1 %v1497_v11  ;;  %v100_v52 = vld [vmem:[#allocation2 + $0x8] sm:$0xff]  ;;  %v99_v54 = vld [vmem:[#allocation2] sm:$0xff]  ;;  %v1547_v0 = vld [vmem:[#allocation5 + $0x200] ss:$8 sps:$4 sm:$0xff]   ;;  %s1273_s28 = sshll.u32 %s1792_s1, 4  ;;  %s1274_s28 = int_to_ptr.vmem [resolvable:$true] %s1273_s28 }
  0x5b   :  { %v104_v55 = vld [vmem:[#allocation2 + $0x28] sm:$0xff]  ;;  %v1552_v2 = vld [vmem:[#allocation5 + $0x124] ss:$8 sps:$4 sm:$0xff]   ;;  %v1550_v4 = vld [vmem:[#allocation5 + $0x120] ss:$8 sps:$4 sm:$0xff]   ;;  %p1754_p5 = scmp.lt.s32.totalorder %s1274_s28, %s1274_s28 }
  0x5c   :  { %v1555_v3 = vld [vmem:[#allocation5 + $0x214] ss:$8 sps:$4 sm:$0xff]   ;;  %v1553_v8 = vld [vmem:[#allocation5 + $0x210] ss:$8 sps:$4 sm:$0xff]   ;;  %v1561_v9 = vld [vmem:[#allocation5 + $0x224] ss:$8 sps:$4 sm:$0xff]  }
  0x5d   :  { %797 = vmatpush1.bf16.msra.mxu1 %v1499_v12  ;;  %v1558_v7 = vld [vmem:[#allocation5 + $0x134] ss:$8 sps:$4 sm:$0xff]   ;;  %v1556_v10 = vld [vmem:[#allocation5 + $0x130] ss:$8 sps:$4 sm:$0xff]   ;;  %v1564_v11 = vld [vmem:[#allocation5 + $0x144] ss:$8 sps:$4 sm:$0xff]  }
  0x5e   :  { %798 = vmatprep.subr.bf16.mxu1 %v1500_v13  ;;  %v1559_v12 = vld [vmem:[#allocation5 + $0x220] ss:$8 sps:$4 sm:$0xff]   ;;  %v1567_v13 = vld [vmem:[#allocation5 + $0x234] ss:$8 sps:$4 sm:$0xff]   ;;  %v1573_v18 = vld [vmem:[#allocation5 + $0x244] ss:$8 sps:$4 sm:$0xff]  }
  0x5f   :  { %v1562_v14 = vld [vmem:[#allocation5 + $0x140] ss:$8 sps:$4 sm:$0xff]   ;;  %v1570_v15 = vld [vmem:[#allocation5 + $0x154] ss:$8 sps:$4 sm:$0xff]   ;;  %v1576_v21 = vld [vmem:[#allocation5 + $0x164] ss:$8 sps:$4 sm:$0xff]  }
  0x60   :  { %v121_v17 = vld [vmem:[%s1947_s2] sm:$0xff]  ;;  %v1571_v23 = vld [vmem:[#allocation5 + $0x240] ss:$8 sps:$4 sm:$0xff]  }
  0x61   :  { %799 = vmatpush1.bf16.msra.mxu1 %v1502_v16  ;;  %v1565_v16 = vld [vmem:[#allocation5 + $0x230] ss:$8 sps:$4 sm:$0xff]   ;;  %v1582_v26 = vld [vmem:[#allocation5 + $0x174] ss:$8 sps:$4 sm:$0xff]  }
  0x62   :  { %800 = vmatprep.subr.bf16.mxu1 %v1503_v19  ;;  %v1568_v19 = vld [vmem:[#allocation5 + $0x150] ss:$8 sps:$4 sm:$0xff]  }
  0x63   :  { %v1577_v27 = vld [vmem:[#allocation5 + $0x250] ss:$8 sps:$4 sm:$0xff]  }
  0x65   :  { %801 = vmatpush1.bf16.msra.mxu1 %v1505_v24  ;;  %v1579_v24 = vld [vmem:[#allocation5 + $0x254] ss:$8 sps:$4 sm:$0xff]  }
  0x66   :  { %802 = vmatprep.subr.bf16.mxu1 %v1506_v25  ;;  %v1574_v25 = vld [vmem:[#allocation5 + $0x160] ss:$8 sps:$4 sm:$0xff]  }
  0x69   :  { %803 = vmatpush1.bf16.msra.mxu1 %v1508_v28  ;;  %v1585_v28 = vld [vmem:[#allocation5 + $0x264] ss:$8 sps:$4 sm:$0xff]  }
  0x6a   :  { %804 = vmatprep.subr.bf16.mxu1 %v1509_v29  ;;  %v1580_v29 = vld [vmem:[#allocation5 + $0x170] ss:$8 sps:$4 sm:$0xff]  }
  0x6d   :  { %805 = vmatpush1.bf16.msra.mxu1 %v1511_v30  ;;  %v1588_v30 = vld [vmem:[#allocation5 + $0x184] ss:$8 sps:$4 sm:$0xff]  }
  0x6e   :  { %806 = vmatprep.subr.bf16.mxu1 %v1512_v31  ;;  %v1583_v31 = vld [vmem:[#allocation5 + $0x260] ss:$8 sps:$4 sm:$0xff]  }
  0x71   :  { %807 = vmatpush1.bf16.msra.mxu1 %v1514_v32  ;;  %v1591_v32 = vld [vmem:[#allocation5 + $0x274] ss:$8 sps:$4 sm:$0xff]  }
  0x72   :  { %808 = vmatprep.subr.bf16.mxu1 %v1515_v33  ;;  %v1586_v33 = vld [vmem:[#allocation5 + $0x180] ss:$8 sps:$4 sm:$0xff]  }
  0x75   :  { %809 = vmatpush1.bf16.msra.mxu1 %v1517_v34  ;;  %v1594_v34 = vld [vmem:[#allocation5 + $0x194] ss:$8 sps:$4 sm:$0xff]  }
  0x76   :  { %810 = vmatprep.subr.bf16.mxu1 %v1518_v35  ;;  %v1589_v35 = vld [vmem:[#allocation5 + $0x270] ss:$8 sps:$4 sm:$0xff]  }
  0x79   :  { %811 = vmatpush1.bf16.msra.mxu1 %v1520_v36  ;;  %v1597_v36 = vld [vmem:[#allocation5 + $0x284] ss:$8 sps:$4 sm:$0xff]  }
  0x7a   :  { %812 = vmatprep.subr.bf16.mxu1 %v1524_v37  ;;  %v1592_v37 = vld [vmem:[#allocation5 + $0x190] ss:$8 sps:$4 sm:$0xff]  }
  0x7d   :  { %813 = vmatpush1.bf16.msra.mxu1 %v1526_v38  ;;  %v1595_v38 = vld [vmem:[#allocation5 + $0x280] ss:$8 sps:$4 sm:$0xff]  }
  0x7e   :  { %814 = vmatprep.subr.bf16.mxu1 %v1530_v39  ;;  %v1603_v39 = vld [vmem:[#allocation5 + $0x294] ss:$8 sps:$4 sm:$0xff]  }
  0x81   :  { %815 = vmatpush1.bf16.msra.mxu1 %v1532_v40  ;;  %v1598_v40 = vld [vmem:[#allocation5 + $0x1a0] ss:$8 sps:$4 sm:$0xff]  }
  0x82   :  { %816 = vmatprep.subr.bf16.mxu1 %v1535_v41  ;;  %v1606_v41 = vld [vmem:[#allocation5 + $0x1b4] ss:$8 sps:$4 sm:$0xff]  }
  0x85   :  { %817 = vmatpush1.bf16.msra.mxu1 %v1537_v42  ;;  %v1601_v42 = vld [vmem:[#allocation5 + $0x290] ss:$8 sps:$4 sm:$0xff]  }
  0x86   :  { %818 = vmatprep.subr.bf16.mxu1 %v1541_v43  ;;  %v1609_v43 = vld [vmem:[#allocation5 + $0x2a4] ss:$8 sps:$4 sm:$0xff]  }
  0x89   :  { %819 = vmatpush1.bf16.msra.mxu1 %v1543_v44  ;;  %v1604_v44 = vld [vmem:[#allocation5 + $0x1b0] ss:$8 sps:$4 sm:$0xff]  }
  0x8a   :  { %870 = vmatprep.subr.bf16.mxu1 %v1549_v45  ;;  %v1612_v45 = vld [vmem:[#allocation5 + $0x1c4] ss:$8 sps:$4 sm:$0xff]  }
  0xcb   :  { %v95_v47 = vpop.permute.xlu0 %94 }
  0xcc   :  { %v97_v48 = vmul.f32 %v95_v47, %v91_v46  ;;  %v1607_v46 = vld [vmem:[#allocation5 + $0x2a0] ss:$8 sps:$4 sm:$0xff]   ;;  %v1615_v47 = vld [vmem:[#allocation5 + $0x2b4] ss:$8 sps:$4 sm:$0xff]  }
  0xce   :  { %v98_v51 = vpack.c.bf16 %v97_v48, %v97_v48  ;;  %v1610_v48 = vld [vmem:[#allocation5 + $0x1c0] ss:$8 sps:$4 sm:$0xff]  }
  0xd0   :  { %1291 = vmatmul.mubr.msk.bf16.vlgmr.msra.gmra.mrb[0].mxu0 %vm256_vm1, %v98_v51  ;;  %v1903_v56 = vpop.permute.xlu0 %106  ;;  %v1621_v51 = vld [vmem:[#allocation5 + $0x2c4] ss:$8 sps:$4 sm:$0xff]  }
  0xd1   :  { %830 = vmatpush1.bf16.msra.mxu0 %v1538_v49  ;;  %v110_v58 = vmul.f32 %v1903_v56, %v100_v52  ;;  %v112_v59 = vmul.f32 %v1903_v56, %v102_v53  ;;  %v109_v60 = vmul.f32 %v1903_v56, %v99_v54  ;;  %v114_v61 = vmul.f32 %v1903_v56, %v104_v55  ;;  %v1618_v49 = vld [vmem:[#allocation5 + $0x1d4] ss:$8 sps:$4 sm:$0xff]   ;;  %v1616_v52 = vld [vmem:[#allocation5 + $0x1d0] ss:$8 sps:$4 sm:$0xff]   ;;  %v1624_v53 = vld [vmem:[#allocation5 + $0x1e4] ss:$8 sps:$4 sm:$0xff]  }
  0xd2   :  { %831 = vmatprep.subr.bf16.mxu0 %v1546_v50  ;;  %v1613_v50 = vld [vmem:[#allocation5 + $0x2b0] ss:$8 sps:$4 sm:$0xff]   ;;  %v1619_v54 = vld [vmem:[#allocation5 + $0x2c0] ss:$8 sps:$4 sm:$0xff]   ;;  %v1627_v55 = vld [vmem:[#allocation5 + $0x2d4] ss:$8 sps:$4 sm:$0xff]  }
  0xd3   :  { %v116_v62 = vpack.c.bf16 %v110_v58, %v110_v58  ;;  %v118_v63 = vpack.c.bf16 %v112_v59, %v112_v59  ;;  %v115_v1 = vpack.c.bf16 %v109_v60, %v109_v60  ;;  %v120_v5 = vpack.c.bf16 %v114_v61, %v114_v61  ;;  %v124_v20 = vpop.permute.xlu1 %123  ;;  %v1630_v58 = vld [vmem:[#allocation5 + $0x1f4] ss:$8 sps:$4 sm:$0xff]   ;;  %v1625_v59 = vld [vmem:[#allocation5 + $0x2d0] ss:$8 sps:$4 sm:$0xff]   ;;  %v101_v60 = vld [vmem:[#allocation2 + $0x10] sm:$0xff] }
  0xd4   :  { %v126_v22 = vmul.f32 %v124_v20, %v121_v17  ;;  %v1633_v61 = vld [vmem:[#allocation5 + $0x2e4] ss:$8 sps:$4 sm:$0xff]   ;;  %v1647_v17 = vld [vmem:[#allocation7 + $0x68] sm:$0xff]  }
  0xd5   :  { %832 = vmatpush1.bf16.msra.mxu0 %v1544_v57  ;;  %820 = vmatprep.mubr.bf16.mxu1 %v116_v62  ;;  %v1622_v57 = vld [vmem:[#allocation5 + $0x1e0] ss:$8 sps:$4 sm:$0xff]   ;;  %v1628_v62 = vld [vmem:[#allocation5 + $0x1f0] ss:$8 sps:$4 sm:$0xff]  }
  0xd6   :  { %861 = vmatprep.mubr.bf16.mxu0 %v118_v63  ;;  %821 = vmatmul.mubr.bf16.vlgmr.msra.gmra.mrb[0].mxu1 %v115_v1  ;;  %v111_v63 = vmul.f32 %v1903_v56, %v101_v60  ;;  %v1636_v1 = vld [vmem:[#allocation5 + $0x2f4] ss:$8 sps:$4 sm:$0xff]   ;;  %v1650_v20 = vld [vmem:[#allocation7 + $0x30] sm:$0xff]  }
  0xd7   :  { %871 = vmatpush1.bf16.msra.mxu1 %v1547_v0  ;;  %833 = vmatprep.subr.bf16.mxu0 %v1552_v2  ;;  %v1631_v0 = vld [vmem:[#allocation5 + $0x2e0] ss:$8 sps:$4 sm:$0xff]   ;;  %v103_v2 = vld [vmem:[#allocation2 + $0x20] sm:$0xff] }
  0xd8   :  { %902 = vmatprep.mubr.bf16.mxu1 %v120_v5  ;;  %872 = vmatprep.subr.bf16.mxu1 %v1555_v3  ;;  %v117_v3 = vpack.c.bf16 %v111_v63, %v111_v63  ;;  %v113_v5 = vmul.f32 %v1903_v56, %v103_v2  ;;  %v1645_v56 = vld [vmem:[#allocation7 + $0x60] sm:$0xff]  }
  0xd9   :  { %834 = vmatpush1.bf16.msra.mxu0 %v1550_v4  ;;  %913 = vperm.xlu1 %1482, %v126_v22   ;;  %v1634_v4 = vld [vmem:[#allocation5 + $0x2f0] ss:$8 sps:$4 sm:$0xff]  }
  0xda   :  { %835 = vmatprep.subr.bf16.mxu0 %v1558_v7  ;;  %945 = vperm.xlu0 %1484, %v126_v22   ;;  %v119_v7 = vpack.c.bf16 %v113_v5, %v113_v5 }
  0xdb   :  { %873 = vmatpush1.bf16.msra.mxu1 %v1553_v8  ;;  %v1637_v8 = vld [vmem:[#allocation7 + $0x40] sm:$0xff]  }
  0xdc   :  { %874 = vmatprep.subr.bf16.mxu1 %v1561_v9  ;;  %v1638_v9 = vld [vmem:[#allocation7] sm:$0xff]  }
  0xdd   :  { %836 = vmatpush1.bf16.msra.mxu0 %v1556_v10  ;;  %1483 = vset.pattern.permute.xlu1 %v1788_v6  ;;  %v1600_v6 = vld [vmem:[#allocation5 + $0x1a4] ss:$8 sps:$4 sm:$0xff]   ;;  %v1639_v10 = vld [vmem:[#allocation7 + $0x48] sm:$0xff]  }
  0xde   :  { %837 = vmatprep.subr.bf16.mxu0 %v1564_v11  ;;  %929 = vperm.xlu1 %1483, %v126_v22   ;;  %v1640_v11 = vld [vmem:[#allocation7 + $0x8] sm:$0xff]   ;;  %v1652_v22 = vld [vmem:[#allocation7 + $0x38] sm:$0xff]  }
  0xdf   :  { %875 = vmatpush1.bf16.msra.mxu1 %v1559_v12  ;;  %v1641_v12 = vld [vmem:[#allocation7 + $0x50] sm:$0xff]  }
  0xe0   :  { %876 = vmatprep.subr.bf16.mxu1 %v1567_v13  ;;  %v1642_v13 = vld [vmem:[#allocation7 + $0x10] sm:$0xff]  }
  0xe1   :  { %838 = vmatpush1.bf16.msra.mxu0 %v1562_v14  ;;  %v1643_v14 = vld [vmem:[#allocation7 + $0x58] sm:$0xff]  }
  0xe2   :  { %839 = vmatprep.subr.bf16.mxu0 %v1570_v15  ;;  %v1644_v15 = vld [vmem:[#allocation7 + $0x18] sm:$0xff]  }
  0xe3   :  { %877 = vmatpush1.bf16.msra.mxu1 %v1565_v16  ;;  %v1646_v16 = vld [vmem:[#allocation7 + $0x20] sm:$0xff]  }
  0xe4   :  { %878 = vmatprep.subr.bf16.mxu1 %v1573_v18  ;;  %v1648_v18 = vld [vmem:[#allocation7 + $0x28] sm:$0xff]  }
  0xe5   :  { %840 = vmatpush1.bf16.msra.mxu0 %v1568_v19  ;;  %v1649_v19 = vld [vmem:[#allocation7 + $0x70] sm:$0xff]  }
  0xe6   :  { %841 = vmatprep.subr.bf16.mxu0 %v1576_v21  ;;  %v1651_v21 = vld [vmem:[#allocation7 + $0x78] sm:$0xff]  }
  0xe7   :  { %879 = vmatpush1.bf16.msra.mxu1 %v1571_v23  ;;  %v1790_v23 = vmov 0.0  }
  0xe8   :  { %880 = vmatprep.subr.bf16.mxu1 %v1579_v24 }
  0xe9   :  { %842 = vmatpush1.bf16.msra.mxu0 %v1574_v25 }
  0xea   :  { %843 = vmatprep.subr.bf16.mxu0 %v1582_v26 }
  0xeb   :  { %881 = vmatpush1.bf16.msra.mxu1 %v1577_v27 }
  0xec   :  { %882 = vmatprep.subr.bf16.mxu1 %v1585_v28 }
  0xed   :  { %844 = vmatpush1.bf16.msra.mxu0 %v1580_v29 }
  0xee   :  { %845 = vmatprep.subr.bf16.mxu0 %v1588_v30 }
  0xef   :  { %883 = vmatpush1.bf16.msra.mxu1 %v1583_v31 }
  0xf0   :  { %884 = vmatprep.subr.bf16.mxu1 %v1591_v32 }
  0xf1   :  { %846 = vmatpush1.bf16.msra.mxu0 %v1586_v33 }
  0xf2   :  { %847 = vmatprep.subr.bf16.mxu0 %v1594_v34  ;;  %v916_v34 = vlaneseq }
  0xf3   :  { %885 = vmatpush1.bf16.msra.mxu1 %v1589_v35 }
  0xf4   :  { %886 = vmatprep.subr.bf16.mxu1 %v1597_v36  ;;  %v917_v35 = vshrl.u32 %v916_v34, 7  ;;  %v228_v36 = vld [vmem:[#allocation5 + $0x328] sm:$0x33] }
  0xf5   :  { %848 = vmatpush1.bf16.msra.mxu0 %v1592_v37  ;;  %v229_v37 = vunpack.c.l.bf16 %v228_v36 }
  0xf6   :  { %849 = vmatprep.subr.bf16.mxu0 %v1600_v6  ;;  %v918_v6 = vsub.s32 0, %v917_v35 }
  0xf7   :  { %887 = vmatpush1.bf16.msra.mxu1 %v1595_v38  ;;  %v230_v38 = vunpack.c.h.bf16 %v228_v36 }
  0xf8   :  { %888 = vmatprep.subr.bf16.mxu1 %v1603_v39 }
  0xf9   :  { %850 = vmatpush1.bf16.msra.mxu0 %v1598_v40 }
  0xfa   :  { %851 = vmatprep.subr.bf16.mxu0 %v1606_v41 }
  0xfb   :  { %889 = vmatpush1.bf16.msra.mxu1 %v1601_v42 }
  0xfc   :  { %890 = vmatprep.subr.bf16.mxu1 %v1609_v43  ;;  %v934_v43 = vsub.s32 1, %v917_v35 }
  0xfd   :  { %852 = vmatpush1.bf16.msra.mxu0 %v1604_v44 }
  0xfe   :  { %853 = vmatprep.subr.bf16.mxu0 %v1612_v45 }
  0xff   :  { %891 = vmatpush1.bf16.msra.mxu1 %v1607_v46  ;;  %v919_v46 = vrot.slane %v229_v37, %v918_v6 }
 0x100   :  { %892 = vmatprep.subr.bf16.mxu1 %v1615_v47 }
 0x101   :  { %854 = vmatpush1.bf16.msra.mxu0 %v1610_v48  ;;  %v950_v48 = vsub.s32 2, %v917_v35 }
 0x102   :  { %855 = vmatprep.subr.bf16.mxu0 %v1618_v49  ;;  %v923_v49 = vrot.slane %v230_v38, %v918_v6 }
 0x103   :  { %893 = vmatpush1.bf16.msra.mxu1 %v1613_v50  ;;  %v935_v50 = vrot.slane %v229_v37, %v934_v43  ;;  %v955_v60 = vrot.slane %v230_v38, %v950_v48 }
 0x104   :  { %894 = vmatprep.subr.bf16.mxu1 %v1621_v51  ;;  %v939_v51 = vrot.slane %v230_v38, %v934_v43 }
 0x105   :  { %856 = vmatpush1.bf16.msra.mxu0 %v1616_v52 }
 0x106   :  { %857 = vmatprep.subr.bf16.mxu0 %v1624_v53 }
 0x107   :  { %895 = vmatpush1.bf16.msra.mxu1 %v1619_v54 }
 0x108   :  { %896 = vmatprep.subr.bf16.mxu1 %v1627_v55  ;;  %v951_v55 = vrot.slane %v229_v37, %v950_v48 }
 0x109   :  { %858 = vmatpush1.bf16.msra.mxu0 %v1622_v57 }
 0x10a   :  { %859 = vmatprep.subr.bf16.mxu0 %v1630_v58 }
 0x10b   :  { %897 = vmatpush1.bf16.msra.mxu1 %v1625_v59 }
 0x10c   :  { %898 = vmatprep.subr.bf16.mxu1 %v1633_v61 }
 0x10d   :  { %860 = vmatpush1.bf16.msra.mxu0 %v1628_v62 }
 0x10e   :  { %1414 = vmatprep.subr.bf16.mxu0 %v1637_v8 }
 0x10f   :  { %899 = vmatpush1.bf16.msra.mxu1 %v1631_v0  ;;  %v960_v0 = vld [vmem:[%s1950_s5] sm:$0x3] }
 0x110   :  { %862 = vmatmul.mubr.bf16.vlgmr.msra.gmra.mrb[4].mxu0 %v117_v3  ;;  %900 = vmatprep.subr.bf16.mxu1 %v1636_v1 }
 0x111   :  { %1415 = vmatpush3.bf16.msra.mxu0 %v1638_v9  ;;  %v965_v9 = vrot.slane %v960_v0, %v918_v6  ;;  %v1405_v6 = vld [vmem:[%s1954_s9] ss:$0 sm:$0xff] }
 0x112   :  { %1416 = vmatprep.subr.bf16.mxu0 %v1639_v10 }
 0x113   :  { %901 = vmatpush1.bf16.msra.mxu1 %v1634_v4 }
 0x115   :  { %1417 = vmatpush3.bf16.msra.mxu0 %v1640_v11 }
 0x116   :  { %903 = vmatmul.mubr.bf16.vlgmr.msra.gmra.mrb[4].mxu1 %v119_v7  ;;  %1418 = vmatprep.subr.bf16.mxu0 %v1641_v12  ;;  %v969_v12 = vrot.slane %v960_v0, %v934_v43 }
 0x119   :  { %1419 = vmatpush3.bf16.msra.mxu0 %v1642_v13 }
 0x11a   :  { %1420 = vmatprep.subr.bf16.mxu0 %v1643_v14 }
 0x11d   :  { %1421 = vmatpush3.bf16.msra.mxu0 %v1644_v15 }
 0x11e   :  { %1422 = vmatprep.subr.bf16.mxu0 %v1645_v56 }
 0x121   :  { %1423 = vmatpush3.bf16.msra.mxu0 %v1646_v16 }
 0x122   :  { %1424 = vmatprep.subr.bf16.mxu0 %v1647_v17 }
 0x125   :  { %1425 = vmatpush3.bf16.msra.mxu0 %v1648_v18 }
 0x126   :  { %1426 = vmatprep.subr.bf16.mxu0 %v1649_v19  ;;  %v1653_v19 = vld [vmem:[#allocation8] sm:$0xff]  }
 0x129   :  { %1427 = vmatpush3.bf16.msra.mxu0 %v1650_v20 }
 0x12a   :  { %1428 = vmatprep.subr.bf16.mxu0 %v1651_v21  ;;  %v1654_v21 = vld [vmem:[#allocation8 + $0x8] sm:$0xff]  }
 0x12d   :  { %1429 = vmatpush3.bf16.msra.mxu0 %v1652_v22  ;;  %v1655_v22 = vld [vmem:[#allocation8 + $0x10] sm:$0xff]  }
 0x12e   :  { %1445 = vmatprep.subr.bf16.mxu0 %v1790_v23 }
 0x158   :  { %v914_v39 = vpop.permute.xlu1 %913 }
 0x159   :  { %v924_v54 = vmul.f32 %v919_v46, %v914_v39  ;;  %v925_v59 = vmul.f32 %v923_v49, %v914_v39  ;;  %v946_v61 = vpop.permute.xlu0 %945 }
 0x15a   :  { %v956_v7 = vmul.f32 %v951_v55, %v946_v61  ;;  %v957_v10 = vmul.f32 %v955_v60, %v946_v61 }
 0x15d   :  { %v930_v52 = vpop.permute.xlu1 %929 }
 0x15e   :  { %v940_v1 = vmul.f32 %v935_v50, %v930_v52  ;;  %v941_v4 = vmul.f32 %v939_v51, %v930_v52 }
 0x1a3   :  { %v301_v24 = vpop.f32.mrb[0].mxu0 }
 0x1a4   :  { %v303_v25 = vpop.f32.mrb[1].mxu0 }
 0x1a5   :  { %v305_v26 = vpop.f32.mrb[2].mxu0 }
 0x1a6   :  { %v306_v27 = vpop.f32.mrb[3].mxu0  ;;  %v1658_v26 = vld [vmem:[#allocation8 + $0x28] sm:$0xff]  }
 0x1a7   :  { %v1659_v27 = vld [vmem:[#allocation8 + $0x30] sm:$0xff]  }
 0x1a9   :  { %v822_v28 = vpop.f32.mrb[0].mxu1 }
 0x1aa   :  { %v823_v29 = vadd.f32 %v822_v28, %v301_v24  ;;  %v824_v30 = vpop.f32.mrb[1].mxu1  ;;  %v1656_v24 = vld [vmem:[#allocation8 + $0x18] sm:$0xff]  }
 0x1ab   :  { %v825_v31 = vadd.f32 %v824_v30, %v303_v25  ;;  %v826_v32 = vpop.f32.mrb[2].mxu1  ;;  %v1657_v25 = vld [vmem:[#allocation8 + $0x20] sm:$0xff]   ;;  %v1660_v28 = vld [vmem:[#allocation8 + $0x38] sm:$0xff]  }
 0x1ac   :  { %v827_v33 = vpop.f32.mrb[3].mxu1  ;;  %v1388_v30 = vld [vmem:[%s1952_s7] ss:$0 sm:$0xff]  ;;  %s1749_s7 = scalar_lea.vmem %s1274_s28, 128 }
 0x1ad   :  { %p1750_p4 = scmp.ne.s32.totalorder %s1274_s28, %s1749_s7  ;;  %p1755_p6 = scmp.lt.s32.totalorder %s1749_s7, %s1749_s7 }
 0x1af   :  { %p1756_p7 = por %p1755_p6, %p1754_p5 }
 0x1b1   :  { %p1757_p8 = pnand %p1756_p7, %p1750_p4 }
 0x1e3   :  { %v863_v40 = vpop.f32.mrb[4].mxu0 }
 0x1e4   :  { %v864_v41 = vadd.f32 %v863_v40, %v823_v29  ;;  %v865_v42 = vpop.f32.mrb[5].mxu0 }
 0x1e5   :  { %v866_v44 = vadd.f32 %v865_v42, %v825_v31  ;;  %v867_v45 = vpop.f32.mrb[6].mxu0 }
 0x1e6   :  { %v868_v47 = vpop.f32.mrb[7].mxu0 }
 0x1e9   :  { %v904_v53 = vpop.f32.mrb[4].mxu1 }
 0x1ea   :  { %v905_v57 = vadd.f32 %v904_v53, %v864_v41  ;;  %v906_v58 = vpop.f32.mrb[5].mxu1 }
 0x1eb   :  { %v907_v62 = vadd.f32 %v906_v58, %v866_v44  ;;  %v908_v63 = vpop.f32.mrb[6].mxu1 }
 0x1ec   :  { %v926_v2 = vadd.f32 %v924_v54, %v905_v57  ;;  %v909_v3 = vpop.f32.mrb[7].mxu1 }
 0x1ed   :  { %v927_v5 = vadd.f32 %v925_v59, %v907_v62 }
 0x1ee   :  { %v942_v8 = vadd.f32 %v940_v1, %v926_v2 }
 0x1ef   :  { %v943_v11 = vadd.f32 %v941_v4, %v927_v5 }
 0x1f0   :  { %v958_v13 = vadd.f32 %v956_v7, %v942_v8 }
 0x1f1   :  { %v959_v14 = vadd.f32 %v957_v10, %v943_v11 }
 0x1f2   :  { %v972_v15 = vadd.f32 %v965_v9, %v958_v13 }
 0x1f3   :  { %v973_v56 = vadd.f32 %v969_v12, %v959_v14 }
 0x1f4   :  { %v974_v16 = vmax.f32 %v972_v15, 0.0 }
 0x1f5   :  { %v975_v17 = vmax.f32 %v973_v56, 0.0 }
 0x1f6   :  { %v976_v20 = vpack.c.bf16 %v974_v16, %v974_v16 }
 0x1f7   :  { %v977_v18 = vpack.c.bf16 %v975_v17, %v975_v17 }
 0x1f9   :  { %1145 = vmatprep.mubr.bf16.mxu0 %v977_v18 }
 0x1fa   :  { %1146 = vmatmul.mubr.bf16.vlgmr.msra.gmra.mrb[8].mxu0 %v976_v20 }
 0x1fb   :  { %1446 = vmatpush3.bf16.msra.mxu0 %v1653_v19  ;;  %1461 = vmatprep.mubr.msk.bf16.mxu0 %vm1791_vm2, %v1790_v23 }
 0x1fc   :  { %1447 = vmatprep.subr.bf16.mxu0 %v1790_v23 }
 0x1ff   :  { %1448 = vmatpush3.bf16.msra.mxu0 %v1654_v21 }
 0x200   :  { %1449 = vmatprep.subr.bf16.mxu0 %v1790_v23 }
 0x203   :  { %1450 = vmatpush3.bf16.msra.mxu0 %v1655_v22 }
 0x204   :  { %1451 = vmatprep.subr.bf16.mxu0 %v1790_v23 }
 0x207   :  { %1452 = vmatpush3.bf16.msra.mxu0 %v1656_v24 }
 0x208   :  { %1453 = vmatprep.subr.bf16.mxu0 %v1790_v23 }
 0x20b   :  { %1454 = vmatpush3.bf16.msra.mxu0 %v1657_v25 }
 0x20c   :  { %1455 = vmatprep.subr.bf16.mxu0 %v1790_v23 }
 0x20f   :  { %1456 = vmatpush3.bf16.msra.mxu0 %v1658_v26 }
 0x210   :  { %1457 = vmatprep.subr.bf16.mxu0 %v1790_v23 }
 0x213   :  { %1458 = vmatpush3.bf16.msra.mxu0 %v1659_v27 }
 0x214   :  { %1459 = vmatprep.subr.bf16.mxu0 %v1790_v23 }
 0x217   :  { %1460 = vmatpush3.bf16.msra.mxu0 %v1660_v28 }
 0x2cd   :  { %v1430_v29 = vpop.f32.mrb[8].mxu0 }
 0x2ce   :  { %v1431_v31 = vpop.f32.mrb[9].mxu0 }
 0x2cf   :  { %v1432_v32 = vadd.f32 %v1431_v31, %v1430_v29  ;;  %v1433_v33 = vpop.f32.mrb[10].mxu0 }
 0x2d0   :  { %v1434_v34 = vpop.f32.mrb[11].mxu0 }
 0x2d1   :  { %v1148_v35 = vadd.f32 %v1432_v32, %v1388_v30 }
 0x2d3   :  { %v1153_v36 = vmax.f32 %v1148_v35, 0.0 }
 0x2d5   :  { %v1154_v37 = vpack.c.bf16 %v1153_v36, %v1153_v36 }
 0x2d7   :  { %1462 = vmatmul.mubr.bf16.vlgmr.msra.gmra.mrb[12].mxu0 %v1154_v37 }
 0x3aa   :  { %v1260_v23 = vpop.f32.mrb[12].mxu0 }
 0x3ab   :  { %v1261_v38 = vadd.f32 %v1405_v6, %v1260_v23  ;;  %v1463_v39 = vpop.f32.mrb[13].mxu0 }
 0x3ac   :  { %v1263_v40 = vpop.f32.mrb[14].mxu0 }
 0x3ad   :  { %1266 = vst [vmem:[#allocation10] sm:$0xff] %v1261_v38  ;;  %v1464_v41 = vpop.f32.mrb[15].mxu0 }
 0x3ae   :  { %1760 = shalt.err (!%p1757_p8)
}
 0x3af   :  { %s1761_s9 = scalar_lea.hbm %s1955_s10, 128 }
 0x3b0   :  { %p1762_p9 = scmp.ne.s32.totalorder %s1955_s10, %s1761_s9  ;;  %p1765_p10 = scmp.lt.u32.totalorder %s1761_s9, %s1955_s10 }
 0x3b2   :  { %p1767_p11 = pnand %p1765_p10, %p1762_p9 }
 0x3b4   :  { %1770 = shalt.err (!%p1767_p11)
}
 0x3b5   :  { %1276 = dma.vmem_to_hbm [thread:$0]  %s1274_s28, 128, %s1955_s10, [#allocation4]  }
 0x3b6   :  { %1777 = dma.done.wait [#allocation4], 128  }
 0x3b7   :  { %1778 = vsyncadd [#allocation4], 4294967168 }
 0x3b8   :  { %1280 = vsyncpa [#allocation3], 1 }
 0x3b9   :  { %1281 = vsyncpa [#allocation6], 1 }
 0x3ba   :  { %1282 = vsyncpa [#allocation9], 1 }
 0x3bb   :  { %1283 = vsyncpa [#allocation4], 1 }

</bundles_post_ra>
